<compile_context>
chip_gen: v5e
topology: v5e:2x2
jax: 0.10.0
libtpu: 0.0.40
codegen_flags: <defaults>
</compile_context>

<pallas_src>
import functools

import numpy as np
import jax
import jax.numpy as jnp
from jax import lax
from jax.experimental import pallas as pl
from jax.experimental.pallas import tpu as pltpu


# ---------------------------------------------------------------------------
# Parameter construction (glue, plain numpy/JAX — mirrors makeBodyMapper + __init__)
# ---------------------------------------------------------------------------
def make_body_mapper_np():
    base = np.zeros((23, 23 * 3, 22 * 3), dtype=np.float32)
    eye3 = np.eye(3, dtype=np.float32)
    for i in range(23):
        if i == 0:
            base[i][1 * 3:15 * 3, :3] = np.concatenate([eye3] * 14, axis=0)
            base[i][15 * 3:19 * 3, 14 * 3:15 * 3] = np.concatenate([eye3] * 4, axis=0)
            base[i][19 * 3:23 * 3, 18 * 3:19 * 3] = np.concatenate([eye3] * 4, axis=0)
        elif 1 <= i <= 3:
            start_row, end_row = i + 1, 15
            base[i][start_row * 3:end_row * 3, 3 * i:3 * (i + 1)] = np.concatenate(
                [eye3] * (14 - i), axis=0)
        elif i == 4:
            start_row, end_row = i + 1, 7
            base[i][start_row * 3:end_row * 3, 3 * i:3 * (i + 1)] = np.concatenate(
                [eye3] * 2, axis=0)
            base[i][end_row * 3:(end_row + 4) * 3, 3 * (i + 2):3 * (i + 3)] = np.concatenate(
                [eye3] * 4, axis=0)
            base[i][(end_row + 4) * 3:(end_row + 8) * 3, 3 * (i + 6):3 * (i + 7)] = np.concatenate(
                [eye3] * 4, axis=0)
        elif i == 5:
            start_row, end_row = i + 1, 7
            base[i][start_row * 3:end_row * 3, 3 * i:3 * (i + 1)] = np.concatenate(
                [eye3] * 1, axis=0)
        elif i >= 7:
            start_col, start_row = i * 3, (i + 1) * 3
            num_ident = 3 - (i - 7) % 4
            end_row = start_row + 3 * num_ident
            if num_ident >= 1:
                base[i][start_row:end_row, start_col:start_col + 3] = np.concatenate(
                    [eye3] * num_ident, axis=0)
    return base


def build_mapper(bone_trans):
    base = jnp.asarray(make_body_mapper_np())                       # (23, 69, 66)
    mapped = jnp.einsum('JMN,N->JM', base, bone_trans)              # (23, 69)
    return mapped.reshape(23, 23, 3)                                # mapper[J, L, N]


def build_weight_block_diag(mapper):
    """(23,23,3) mapper -> (72,216) block-diagonal, 24-aligned stationary weight.

    W[24*m + l, 72*m + 24*n + j] = mapper[j, l, n] for j,l < 23 (zeros elsewhere).
    """
    wt = jnp.transpose(mapper.astype(jnp.float32), (1, 2, 0))       # (L=23, N=3, J=23)
    wt = jnp.pad(wt, ((0, 1), (0, 0), (0, 1)))                      # (24, 3, 24)
    wt_pad = wt.reshape(24, 72)                                     # Wt_pad[l, 24n + j]
    w_big = jnp.zeros((72, 216), dtype=jnp.float32)
    for m in range(3):
        w_big = w_big.at[24 * m:24 * (m + 1), 72 * m:72 * (m + 1)].set(wt_pad)
    return w_big


# ---------------------------------------------------------------------------
# Pallas kernel: 6D-rotation -> matrix rows, fused block-diagonal contraction.
# ---------------------------------------------------------------------------
_EPS = 1e-12               # matches torch.nn.functional.normalize default eps
_EPS_SQ = _EPS * _EPS


def body_maker_kernel(o_ref, w_ref, out_ref, s_ref, *, use_bf16=False):
    # o_ref:   (6, 24, tf)  -- a1x,a1y,a1z,a2x,a2y,a2z planes, [component][joint, frame]
    # w_ref:   (72, 216)    -- block-diag W[24m+l, 72m+24n+j] = mapper[j, l, n]
    # out_ref: (3, 24, tf)  -- out[m, l, f] (joint l=23 is padding)
    # s_ref:   (216, tf)    -- VMEM scratch, rows [72m+24n : +24] = row m, component n
    a1 = [o_ref[0], o_ref[1], o_ref[2]]
    a2 = [o_ref[3], o_ref[4], o_ref[5]]

    # b1 = a1 / max(||a1||, eps)  via rsqrt on sum of squares (EUP slot)
    n1sq = a1[0] * a1[0] + a1[1] * a1[1] + a1[2] * a1[2]
    inv1 = lax.rsqrt(jnp.maximum(n1sq, _EPS_SQ))
    b1 = [c * inv1 for c in a1]

    # b2 = normalize(a2 - <b1, a2> b1)
    d = b1[0] * a2[0] + b1[1] * a2[1] + b1[2] * a2[2]
    u2 = [a2[k] - d * b1[k] for k in range(3)]
    n2sq = u2[0] * u2[0] + u2[1] * u2[1] + u2[2] * u2[2]
    inv2 = lax.rsqrt(jnp.maximum(n2sq, _EPS_SQ))
    b2 = [c * inv2 for c in u2]

    # b3 = b1 x b2
    b3 = [b1[1] * b2[2] - b1[2] * b2[1],
          b1[2] * b2[0] - b1[0] * b2[2],
          b1[0] * b2[1] - b1[1] * b2[0]]

    # Write each (24, tf) component into its 24-row-aligned slot (no concatenates).
    rows = (b1, b2, b3)   # rows[m][n][j, f] == mat[f, j, m, n]
    for m in range(3):
        for n in range(3):
            s_ref[pl.ds(72 * m + 24 * n, 24), :] = rows[m][n]

    # Single fused MXU dot: (72, 216) @ (216, tf) -> (72, tf).
    if use_bf16:
        # Opt-in (mainly v5e): halves vmatmul pushes, ~1e-3 relative error.
        res = jnp.dot(w_ref[...].astype(jnp.bfloat16),
                      s_ref[...].astype(jnp.bfloat16),
                      preferred_element_type=jnp.float32)
    else:
        res = jnp.dot(w_ref[...], s_ref[...],
                      preferred_element_type=jnp.float32)

    # out[m][l, f] = res[24*m + l, f]  (24-aligned slices, lane-dense stores)
    for m in range(3):
        out_ref[m] = res[24 * m:24 * (m + 1), :]


# ---------------------------------------------------------------------------
# Wrappers
# ---------------------------------------------------------------------------
def body_maker_planes(o_planes, w_big, tf, *, use_bf16=False):
    """Plane-layout entry point (no layout conversion / transposes).

    o_planes: (6, 24, F_pad) f32, joint 23 zero-padded, F_pad % tf == 0, tf % 128 == 0.
    w_big:    (72, 216) f32 block-diagonal fused weight.
    returns   (3, 24, F_pad) f32 with out[m, l, f] (joint l=23 is padding).
    """
    _, j24, F_pad = o_planes.shape
    assert j24 == 24 and F_pad % tf == 0 and tf % 128 == 0

    compiler_kwargs = dict(dimension_semantics=("parallel",))
    if tf > 2048:
        # v5e scoped-VMEM default is only 16 MiB; large frame tiles need headroom.
        compiler_kwargs["vmem_limit_bytes"] = int(4 * tf * 1104 + (2 << 20))

    kernel = functools.partial(body_maker_kernel, use_bf16=use_bf16)
    return pl.pallas_call(
        kernel,
        out_shape=jax.ShapeDtypeStruct((3, 24, F_pad), jnp.float32),
        grid_spec=pltpu.PrefetchScalarGridSpec(
            num_scalar_prefetch=0,
            grid=(F_pad // tf,),
            in_specs=[
                pl.BlockSpec((6, 24, tf), lambda f: (0, 0, f)),
                pl.BlockSpec((72, 216), lambda f: (0, 0)),
            ],
            out_specs=pl.BlockSpec((3, 24, tf), lambda f: (0, 0, f)),
            scratch_shapes=[pltpu.VMEM((216, tf), jnp.float32)],
        ),
        compiler_params=pltpu.CompilerParams(**compiler_kwargs),
    )(o_planes, w_big)


def body_maker_forward(orientation, mapper, tf=2048, *, use_bf16=False):
    """Torch-layout wrapper: orientation (F,23,6), mapper (23,23,3) -> (F,23,3).

    For large F, prefer calling body_maker_planes directly with data already in
    plane layout — the HBM transposes below dominate end-to-end time otherwise.
    """
    F_, J, C = orientation.shape
    assert J == 23 and C == 6

    # Frame padding to a lane-friendly multiple of 128, then choose the frame tile.
    F_pad = max(128, -(-F_ // 128) * 128)
    tf = max(128, (min(tf, F_pad) // 128) * 128)
    if F_pad >= 256:
        # Ensure >= 2 grid steps so both v7x TensorCores get work.
        tf = min(tf, max(128, (F_pad // 2 // 128) * 128))
    F_pad = -(-F_pad // tf) * tf

    # Layout conversion kept minimal (transpose + pad joints 23->24, frames F->F_pad).
    o_t = jnp.transpose(orientation.astype(jnp.float32), (2, 1, 0))      # (6, 23, F)
    o_t = jnp.pad(o_t, ((0, 0), (0, 1), (0, F_pad - F_)))                # (6, 24, F_pad)

    w_big = build_weight_block_diag(mapper)                              # (72, 216)

    out = body_maker_planes(o_t, w_big, tf, use_bf16=use_bf16)           # (3, 24, F_pad)
    return jnp.transpose(out, (2, 1, 0))[:F_, :23, :]                    # (F, 23, 3)


# ---------------------------------------------------------------------------
# Pure-JAX reference (for correctness check)
# ---------------------------------------------------------------------------
def rotation_6d_to_matrix_ref(d6):
    a1, a2 = d6[..., :3], d6[..., 3:]
    b1 = a1 / jnp.maximum(jnp.linalg.norm(a1, axis=-1, keepdims=True), _EPS)
    d = jnp.sum(b1 * a2, axis=-1, keepdims=True)
    u2 = a2 - d * b1
    b2 = u2 / jnp.maximum(jnp.linalg.norm(u2, axis=-1, keepdims=True), _EPS)
    b3 = jnp.cross(b1, b2)
    return jnp.stack([b1, b2, b3], axis=-2)


def forward_ref(orientation, mapper):
    mat = rotation_6d_to_matrix_ref(orientation)                      # (F,23,3,3)
    batched = jnp.einsum('FJMN,JLN->FJLM', mat, mapper)               # (F,23,23,3)
    return jnp.sum(batched, axis=1)                                   # (F,23,3)


if __name__ == "__main__":
    key = jax.random.PRNGKey(0)
    k_bone, k_orient, k_orient2 = jax.random.split(key, 3)

    # Deterministic parameter init (bone_trans plays the role of the ckpt value).
    bone_trans = jax.random.normal(k_bone, (66,), dtype=jnp.float32)
    mapper = build_mapper(bone_trans)                                 # (23, 23, 3)

    # Small shape: single-tile case.
    F_ = 16
    orientation = jax.random.normal(k_orient, (F_, 23, 6), dtype=jnp.float32)
    out = jax.block_until_ready(body_maker_forward(orientation, mapper))
    ref = forward_ref(orientation, mapper)
    assert out.shape == (F_, 23, 3)
    assert jnp.allclose(out, ref, atol=1e-4, rtol=1e-4), "mismatch vs reference (single tile)"

    # Multi-tile + padding case (grid > 1, F not a multiple of the tile).
    F2 = 300
    orientation2 = jax.random.normal(k_orient2, (F2, 23, 6), dtype=jnp.float32)
    out2 = jax.block_until_ready(body_maker_forward(orientation2, mapper))
    ref2 = forward_ref(orientation2, mapper)
    assert out2.shape == (F2, 23, 3)
    assert jnp.allclose(out2, ref2, atol=1e-4, rtol=1e-4), "mismatch vs reference (multi tile)"

    print("KERNEL_OK")
</pallas_src>

<mosaic_0001>
module attributes {stable_mosaic.version = 11 : i64} {
  func.func @body_maker_kernel(%arg0: i32, %arg1: memref<6x24x128xf32, #tpu.memory_space<vmem>>, %arg2: memref<72x216xf32, #tpu.memory_space<vmem>>, %arg3: memref<3x24x128xf32, #tpu.memory_space<vmem>>, %arg4: memref<216x128xf32, #tpu.memory_space<vmem>>) attributes {dimension_semantics = [#tpu.dimension_semantics<parallel>], iteration_bounds = array<i64: 1>, scalar_prefetch = 0 : i64, scratch_operands = 1 : i64, tpu.core_type = #tpu.core_type<tc>, window_params = [{transform_indices = @transform_0, window_bounds = array<i64: 6, 24, 128>}, {pipeline_mode = #tpu.pipeline_mode<synchronous>, transform_indices = @transform_1, window_bounds = array<i64: 72, 216>}, {transform_indices = @transform_2, window_bounds = array<i64: 3, 24, 128>}]} {
    %c0 = arith.constant 0 : index
    %c0_0 = arith.constant 0 : index
    %c0_1 = arith.constant 0 : index
    %0 = vector.load %arg1[%c0, %c0_0, %c0_1] : memref<6x24x128xf32, #tpu.memory_space<vmem>>, vector<1x24x128xf32>
    %1 = vector.shape_cast %0 : vector<1x24x128xf32> to vector<24x128xf32>
    %c1 = arith.constant 1 : index
    %c0_2 = arith.constant 0 : index
    %c0_3 = arith.constant 0 : index
    %2 = vector.load %arg1[%c1, %c0_2, %c0_3] : memref<6x24x128xf32, #tpu.memory_space<vmem>>, vector<1x24x128xf32>
    %3 = vector.shape_cast %2 : vector<1x24x128xf32> to vector<24x128xf32>
    %c2 = arith.constant 2 : index
    %c0_4 = arith.constant 0 : index
    %c0_5 = arith.constant 0 : index
    %4 = vector.load %arg1[%c2, %c0_4, %c0_5] : memref<6x24x128xf32, #tpu.memory_space<vmem>>, vector<1x24x128xf32>
    %5 = vector.shape_cast %4 : vector<1x24x128xf32> to vector<24x128xf32>
    %c3 = arith.constant 3 : index
    %c0_6 = arith.constant 0 : index
    %c0_7 = arith.constant 0 : index
    %6 = vector.load %arg1[%c3, %c0_6, %c0_7] : memref<6x24x128xf32, #tpu.memory_space<vmem>>, vector<1x24x128xf32>
    %7 = vector.shape_cast %6 : vector<1x24x128xf32> to vector<24x128xf32>
    %c4 = arith.constant 4 : index
    %c0_8 = arith.constant 0 : index
    %c0_9 = arith.constant 0 : index
    %8 = vector.load %arg1[%c4, %c0_8, %c0_9] : memref<6x24x128xf32, #tpu.memory_space<vmem>>, vector<1x24x128xf32>
    %9 = vector.shape_cast %8 : vector<1x24x128xf32> to vector<24x128xf32>
    %c5 = arith.constant 5 : index
    %c0_10 = arith.constant 0 : index
    %c0_11 = arith.constant 0 : index
    %10 = vector.load %arg1[%c5, %c0_10, %c0_11] : memref<6x24x128xf32, #tpu.memory_space<vmem>>, vector<1x24x128xf32>
    %11 = vector.shape_cast %10 : vector<1x24x128xf32> to vector<24x128xf32>
    %12 = arith.mulf %1, %1 : vector<24x128xf32>
    %13 = arith.mulf %3, %3 : vector<24x128xf32>
    %14 = arith.addf %12, %13 : vector<24x128xf32>
    %15 = arith.mulf %5, %5 : vector<24x128xf32>
    %16 = arith.addf %14, %15 : vector<24x128xf32>
    %cst = arith.constant 1.000000e-24 : f32
    %17 = vector.broadcast %cst : f32 to vector<24x128xf32>
    %18 = arith.maximumf %16, %17 : vector<24x128xf32>
    %19 = math.rsqrt %18 : vector<24x128xf32>
    %20 = arith.mulf %1, %19 : vector<24x128xf32>
    %21 = arith.mulf %3, %19 : vector<24x128xf32>
    %22 = arith.mulf %5, %19 : vector<24x128xf32>
    %23 = arith.mulf %20, %7 : vector<24x128xf32>
    %24 = arith.mulf %21, %9 : vector<24x128xf32>
    %25 = arith.addf %23, %24 : vector<24x128xf32>
    %26 = arith.mulf %22, %11 : vector<24x128xf32>
    %27 = arith.addf %25, %26 : vector<24x128xf32>
    %28 = arith.mulf %27, %20 : vector<24x128xf32>
    %29 = arith.subf %7, %28 : vector<24x128xf32>
    %30 = arith.mulf %27, %21 : vector<24x128xf32>
    %31 = arith.subf %9, %30 : vector<24x128xf32>
    %32 = arith.mulf %27, %22 : vector<24x128xf32>
    %33 = arith.subf %11, %32 : vector<24x128xf32>
    %34 = arith.mulf %29, %29 : vector<24x128xf32>
    %35 = arith.mulf %31, %31 : vector<24x128xf32>
    %36 = arith.addf %34, %35 : vector<24x128xf32>
    %37 = arith.mulf %33, %33 : vector<24x128xf32>
    %38 = arith.addf %36, %37 : vector<24x128xf32>
    %cst_12 = arith.constant 1.000000e-24 : f32
    %39 = vector.broadcast %cst_12 : f32 to vector<24x128xf32>
    %40 = arith.maximumf %38, %39 : vector<24x128xf32>
    %41 = math.rsqrt %40 : vector<24x128xf32>
    %42 = arith.mulf %29, %41 : vector<24x128xf32>
    %43 = arith.mulf %31, %41 : vector<24x128xf32>
    %44 = arith.mulf %33, %41 : vector<24x128xf32>
    %45 = arith.mulf %21, %44 : vector<24x128xf32>
    %46 = arith.mulf %22, %43 : vector<24x128xf32>
    %47 = arith.subf %45, %46 : vector<24x128xf32>
    %48 = arith.mulf %22, %42 : vector<24x128xf32>
    %49 = arith.mulf %20, %44 : vector<24x128xf32>
    %50 = arith.subf %48, %49 : vector<24x128xf32>
    %51 = arith.mulf %20, %43 : vector<24x128xf32>
    %52 = arith.mulf %21, %42 : vector<24x128xf32>
    %53 = arith.subf %51, %52 : vector<24x128xf32>
    %c0_13 = arith.constant 0 : index
    %c0_14 = arith.constant 0 : index
    %54 = vector.load %arg4[%c0_13, %c0_14] : memref<216x128xf32, #tpu.memory_space<vmem>>, vector<24x128xf32>
    tpu.vector_store %arg4[%c0_13, %c0_14], %20 {strides = array<i32>} : memref<216x128xf32, #tpu.memory_space<vmem>>, vector<24x128xf32>,
    %c24 = arith.constant 24 : index
    %c0_15 = arith.constant 0 : index
    %55 = vector.load %arg4[%c24, %c0_15] : memref<216x128xf32, #tpu.memory_space<vmem>>, vector<24x128xf32>
    tpu.vector_store %arg4[%c24, %c0_15], %21 {strides = array<i32>} : memref<216x128xf32, #tpu.memory_space<vmem>>, vector<24x128xf32>,
    %c48 = arith.constant 48 : index
    %c0_16 = arith.constant 0 : index
    %56 = vector.load %arg4[%c48, %c0_16] : memref<216x128xf32, #tpu.memory_space<vmem>>, vector<24x128xf32>
    tpu.vector_store %arg4[%c48, %c0_16], %22 {strides = array<i32>} : memref<216x128xf32, #tpu.memory_space<vmem>>, vector<24x128xf32>,
    %c72 = arith.constant 72 : index
    %c0_17 = arith.constant 0 : index
    %57 = vector.load %arg4[%c72, %c0_17] : memref<216x128xf32, #tpu.memory_space<vmem>>, vector<24x128xf32>
    tpu.vector_store %arg4[%c72, %c0_17], %42 {strides = array<i32>} : memref<216x128xf32, #tpu.memory_space<vmem>>, vector<24x128xf32>,
    %c96 = arith.constant 96 : index
    %c0_18 = arith.constant 0 : index
    %58 = vector.load %arg4[%c96, %c0_18] : memref<216x128xf32, #tpu.memory_space<vmem>>, vector<24x128xf32>
    tpu.vector_store %arg4[%c96, %c0_18], %43 {strides = array<i32>} : memref<216x128xf32, #tpu.memory_space<vmem>>, vector<24x128xf32>,
    %c120 = arith.constant 120 : index
    %c0_19 = arith.constant 0 : index
    %59 = vector.load %arg4[%c120, %c0_19] : memref<216x128xf32, #tpu.memory_space<vmem>>, vector<24x128xf32>
    tpu.vector_store %arg4[%c120, %c0_19], %44 {strides = array<i32>} : memref<216x128xf32, #tpu.memory_space<vmem>>, vector<24x128xf32>,
    %c144 = arith.constant 144 : index
    %c0_20 = arith.constant 0 : index
    %60 = vector.load %arg4[%c144, %c0_20] : memref<216x128xf32, #tpu.memory_space<vmem>>, vector<24x128xf32>
    tpu.vector_store %arg4[%c144, %c0_20], %47 {strides = array<i32>} : memref<216x128xf32, #tpu.memory_space<vmem>>, vector<24x128xf32>,
    %c168 = arith.constant 168 : index
    %c0_21 = arith.constant 0 : index
    %61 = vector.load %arg4[%c168, %c0_21] : memref<216x128xf32, #tpu.memory_space<vmem>>, vector<24x128xf32>
    tpu.vector_store %arg4[%c168, %c0_21], %50 {strides = array<i32>} : memref<216x128xf32, #tpu.memory_space<vmem>>, vector<24x128xf32>,
    %c192 = arith.constant 192 : index
    %c0_22 = arith.constant 0 : index
    %62 = vector.load %arg4[%c192, %c0_22] : memref<216x128xf32, #tpu.memory_space<vmem>>, vector<24x128xf32>
    tpu.vector_store %arg4[%c192, %c0_22], %53 {strides = array<i32>} : memref<216x128xf32, #tpu.memory_space<vmem>>, vector<24x128xf32>,
    %c0_23 = arith.constant 0 : index
    %c0_24 = arith.constant 0 : index
    %63 = vector.load %arg2[%c0_23, %c0_24] : memref<72x216xf32, #tpu.memory_space<vmem>>, vector<72x216xf32>
    %c0_25 = arith.constant 0 : index
    %c0_26 = arith.constant 0 : index
    %64 = vector.load %arg4[%c0_25, %c0_26] : memref<216x128xf32, #tpu.memory_space<vmem>>, vector<216x128xf32>
    %cst_27 = arith.constant dense<0.000000e+00> : vector<72x128xf32>
    %65 = tpu.matmul %63, %64, %cst_27 {dimension_numbers = #tpu.dot_dimension_numbers<[1], [0], [0], [1], [0, 0, 1, 1], [], []>} : vector<72x216xf32>, vector<216x128xf32>, vector<72x128xf32> -> vector<72x128xf32>
    %66 = vector.extract_strided_slice %65 {offsets = [0, 0], sizes = [24, 128], strides = [1, 1]} : vector<72x128xf32> to vector<24x128xf32>
    %c0_28 = arith.constant 0 : index
    %c0_29 = arith.constant 0 : index
    %c0_30 = arith.constant 0 : index
    %67 = vector.load %arg3[%c0_28, %c0_29, %c0_30] : memref<3x24x128xf32, #tpu.memory_space<vmem>>, vector<1x24x128xf32>
    %68 = vector.shape_cast %67 : vector<1x24x128xf32> to vector<24x128xf32>
    %69 = vector.shape_cast %66 : vector<24x128xf32> to vector<1x24x128xf32>
    tpu.vector_store %arg3[%c0_28, %c0_29, %c0_30], %69 {strides = array<i32>} : memref<3x24x128xf32, #tpu.memory_space<vmem>>, vector<1x24x128xf32>,
    %70 = vector.extract_strided_slice %65 {offsets = [24, 0], sizes = [24, 128], strides = [1, 1]} : vector<72x128xf32> to vector<24x128xf32>
    %c1_31 = arith.constant 1 : index
    %c0_32 = arith.constant 0 : index
    %c0_33 = arith.constant 0 : index
    %71 = vector.load %arg3[%c1_31, %c0_32, %c0_33] : memref<3x24x128xf32, #tpu.memory_space<vmem>>, vector<1x24x128xf32>
    %72 = vector.shape_cast %71 : vector<1x24x128xf32> to vector<24x128xf32>
    %73 = vector.shape_cast %70 : vector<24x128xf32> to vector<1x24x128xf32>
    tpu.vector_store %arg3[%c1_31, %c0_32, %c0_33], %73 {strides = array<i32>} : memref<3x24x128xf32, #tpu.memory_space<vmem>>, vector<1x24x128xf32>,
    %74 = vector.extract_strided_slice %65 {offsets = [48, 0], sizes = [24, 128], strides = [1, 1]} : vector<72x128xf32> to vector<24x128xf32>
    %c2_34 = arith.constant 2 : index
    %c0_35 = arith.constant 0 : index
    %c0_36 = arith.constant 0 : index
    %75 = vector.load %arg3[%c2_34, %c0_35, %c0_36] : memref<3x24x128xf32, #tpu.memory_space<vmem>>, vector<1x24x128xf32>
    %76 = vector.shape_cast %75 : vector<1x24x128xf32> to vector<24x128xf32>
    %77 = vector.shape_cast %74 : vector<24x128xf32> to vector<1x24x128xf32>
    tpu.vector_store %arg3[%c2_34, %c0_35, %c0_36], %77 {strides = array<i32>} : memref<3x24x128xf32, #tpu.memory_space<vmem>>, vector<1x24x128xf32>,
    return
  }
  func.func @transform_0(%arg0: i32) -> (i32, i32, i32) {
    %c0_i32 = arith.constant 0 : i32
    %c0_i32_0 = arith.constant 0 : i32
    %c0_i32_1 = arith.constant 0 : i32
    return %c0_i32, %c0_i32_0, %arg0 : i32, i32, i32
  }
  func.func @transform_1(%arg0: i32) -> (i32, i32) {
    %c0_i32 = arith.constant 0 : i32
    %c0_i32_0 = arith.constant 0 : i32
    %c0_i32_1 = arith.constant 0 : i32
    return %c0_i32, %c0_i32_0 : i32, i32
  }
  func.func @transform_2(%arg0: i32) -> (i32, i32, i32) {
    %c0_i32 = arith.constant 0 : i32
    %c0_i32_0 = arith.constant 0 : i32
    %c0_i32_1 = arith.constant 0 : i32
    return %c0_i32, %c0_i32_0, %arg0 : i32, i32, i32
  }
}

</mosaic_0001>

<bundles_post_ra>
// kernel: tpu_custom_call.1
= control target key start
LH: loop header
LB: loop body
LE: loop exit
PB: predicated region body
PF: predicated region fallthrough
CT: control target
= control target key end

     0   :  { %7 = vsyncpa [#allocation4], 0  ;;  %s780_s0 = inlined_call_operand.hbm [shape: f32[6,24,128], index: 0, kind: input, shape index: {}]   ;;  %s781_s1 = inlined_call_operand.hbm [shape: f32[72,216], index: 1, kind: input, shape index: {}]   ;;  %s782_s2 = inlined_call_operand.hbm [shape: f32[3,24,128], index: 2, kind: output, shape index: {}]  }
   0x1   :  { %8 = vsyncpa [#allocation7], 0 }
   0x2   :  { %9 = vsyncpa [#allocation5], 0  ;;  %s14_s11 = sshll.u32 %s780_s0, 4  ;;  %s593_s12 = smov [#allocation3]   ;;  %s15_s11 = int_to_ptr.hbm [resolvable:$true] %s14_s11 }
   0x3   :  { %s16_s13 = sshll.u32 %s593_s12, 4  ;;  %s27_s16 = sshll.u32 %s781_s1, 4  ;;  %s17_s13 = int_to_ptr.vmem [resolvable:$true] %s16_s13  ;;  %s28_s16 = int_to_ptr.hbm [resolvable:$true] %s27_s16 }
   0x4   :  { %s594_s17 = smov 128   ;;  %s595_s18 = smov 8  }
   0x5   :  { %22 = dma.hbm_to_vmem [thread:$0]  %s15_s11, 2304, %s17_s13, [#allocation4], %s594_s17, %s594_s17, %s595_s18  }
   0x6   :  { %s596_s19 = smov [#allocation6]   ;;  %s597_s21 = smov 256  }
   0x7   :  { %s29_s20 = sshll.u32 %s596_s19, 4  ;;  %s598_s0 = smov 16   ;;  %s30_s20 = int_to_ptr.vmem [resolvable:$true] %s29_s20 }
   0x8   :  { %35 = dma.hbm_to_vmem [thread:$0]  %s28_s16, 2304, %s30_s20, [#allocation7], %s597_s21, %s597_s21, %s598_s0  }
   0x9   :  { %587 = dma.done.wait [#allocation4], 2304  }
   0xa   :  { %588 = vsyncadd [#allocation4], 4294964992 }
   0xb   :  { %589 = dma.done.wait [#allocation7], 2304  }
   0xc   :  { %590 = vsyncadd [#allocation7], 4294964992  ;;  %v44_v0 = vld [vmem:[#allocation3] sm:$0xff]  ;;  %v48_v1 = vld [vmem:[#allocation3 + $0x18] sm:$0xff]  ;;  %s599_s1 = smov [#allocation8]   ;;  %s446_s25 = sshll.u32 %s782_s2, 4  ;;  %s447_s25 = int_to_ptr.hbm [resolvable:$true] %s446_s25 }
   0xd   :  { %v52_v2 = vld [vmem:[#allocation3 + $0x30] sm:$0xff]  ;;  %v67_v3 = vmul.f32 %v44_v0, %v44_v0  ;;  %v70_v4 = vmul.f32 %v48_v1, %v48_v1  ;;  %v626_v7 = vld [vmem:[#allocation3 + $0x28] sm:$0xff]  ;;  %v628_v8 = vld [vmem:[#allocation3 + $0x40] sm:$0xff]  ;;  %s444_s22 = sshll.u32 %s599_s1, 4  ;;  %s445_s22 = int_to_ptr.vmem [resolvable:$true] %s444_s22 }
   0xe   :  { %v76_v5 = vmul.f32 %v52_v2, %v52_v2  ;;  %v624_v6 = vld [vmem:[#allocation3 + $0x10] sm:$0xff]  ;;  %v72_v11 = vmul.f32 %v626_v7, %v626_v7  ;;  %v78_v12 = vmul.f32 %v628_v8, %v628_v8  ;;  %v636_v13 = vld [vmem:[#allocation3 + $0x8] sm:$0xff]  ;;  %v638_v14 = vld [vmem:[#allocation3 + $0x20] sm:$0xff] }
   0xf   :  { %v73_v9 = vadd.f32 %v70_v4, %v67_v3  ;;  %v69_v10 = vmul.f32 %v624_v6, %v624_v6  ;;  %v640_v15 = vld [vmem:[#allocation3 + $0x38] sm:$0xff]  ;;  %v68_v18 = vmul.f32 %v636_v13, %v636_v13  ;;  %v71_v19 = vmul.f32 %v638_v14, %v638_v14  ;;  %v56_v42 = vld [vmem:[#allocation3 + $0x48] sm:$0xff]  ;;  %v60_v43 = vld [vmem:[#allocation3 + $0x60] sm:$0xff] }
  0x10   :  { %v77_v20 = vmul.f32 %v640_v15, %v640_v15  ;;  %v64_v44 = vld [vmem:[#allocation3 + $0x78] sm:$0xff]  ;;  %v62_v57 = vld [vmem:[#allocation3 + $0x70] sm:$0xff]  ;;  %v66_v58 = vld [vmem:[#allocation3 + $0x88] sm:$0xff] }
  0x11   :  { %v79_v16 = vadd.f32 %v76_v5, %v73_v9  ;;  %v75_v17 = vadd.f32 %v72_v11, %v69_v10  ;;  %v74_v23 = vadd.f32 %v71_v19, %v68_v18  ;;  %v58_v51 = vld [vmem:[#allocation3 + $0x58] sm:$0xff]  ;;  %v57_v62 = vld [vmem:[#allocation3 + $0x50] sm:$0xff]  ;;  %v61_v63 = vld [vmem:[#allocation3 + $0x68] sm:$0xff] }
  0x12   :  { %v65_v3 = vld [vmem:[#allocation3 + $0x80] sm:$0xff] }
  0x13   :  { %v82_v21 = vmax.f32 %v79_v16, 1e-24  ;;  %v81_v22 = vadd.f32 %v78_v12, %v75_v17  ;;  %v80_v25 = vadd.f32 %v77_v20, %v74_v23 }
  0x15   :  { %503 = vrsqrt.f32 %v82_v21  ;;  %v84_v24 = vmax.f32 %v81_v22, 1e-24  ;;  %v83_v26 = vmax.f32 %v80_v25, 1e-24  ;;  %vm91_vm0 = vweird.f32 %v82_v21 }
  0x17   :  { %505 = vrsqrt.f32 %v84_v24  ;;  %vm111_vm2 = vweird.f32 %v84_v24  ;;  %vm101_vm5 = vweird.f32 %v83_v26 }
  0x18   :  { %507 = vrsqrt.f32 %v83_v26 }
  0x1b   :  { %v504_v27 = vpop.eup %503 }
  0x1c   :  { %v86_v28 = vmul.f32 %v504_v27, %v82_v21  ;;  %vm92_vm1 = vweird.f32 %v504_v27 }
  0x1d   :  { %v506_v29 = vpop.eup %505  ;;  %vm93_vm4 = vmor %vm91_vm0, %vm92_vm1 }
  0x1e   :  { %v87_v30 = vmul.f32 %v504_v27, %v86_v28  ;;  %v106_v31 = vmul.f32 %v506_v29, %v84_v24  ;;  %v508_v32 = vpop.eup %507  ;;  %vm112_vm3 = vweird.f32 %v506_v29 }
  0x1f   :  { %v96_v35 = vmul.f32 %v508_v32, %v83_v26  ;;  %vm102_vm6 = vweird.f32 %v508_v32  ;;  %vm113_vm7 = vmor %vm111_vm2, %vm112_vm3  ;;  %vm313_vm2 = vcmask 719872  }
  0x20   :  { %v88_v33 = vmul.f32 0.5, %v87_v30  ;;  %v107_v34 = vmul.f32 %v506_v29, %v106_v31  ;;  %vm103_vm8 = vmor %vm101_vm5, %vm102_vm6 }
  0x21   :  { %v97_v38 = vmul.f32 %v508_v32, %v96_v35 }
  0x22   :  { %v89_v36 = vsub.f32 1.5, %v88_v33  ;;  %v108_v37 = vmul.f32 0.5, %v107_v34 }
  0x23   :  { %v98_v41 = vmul.f32 0.5, %v97_v38 }
  0x24   :  { %v90_v39 = vmul.f32 %v504_v27, %v89_v36  ;;  %v109_v40 = vsub.f32 1.5, %v108_v37 }
  0x25   :  { %v99_v47 = vsub.f32 1.5, %v98_v41 }
  0x26   :  { %v94_v45 = vsel %vm93_vm4, %v504_v27, %v90_v39  ;;  %v110_v46 = vmul.f32 %v506_v29, %v109_v40 }
  0x27   :  { %v648_v48 = vmul.f32 %v94_v45, %v44_v0  ;;  %v650_v49 = vmul.f32 %v94_v45, %v48_v1  ;;  %v652_v50 = vmul.f32 %v94_v45, %v52_v2  ;;  %v100_v53 = vmul.f32 %v508_v32, %v99_v47 }
  0x28   :  { %v114_v52 = vsel %vm113_vm7, %v506_v29, %v110_v46 }
  0x29   :  { %v124_v54 = vmul.f32 %v648_v48, %v56_v42  ;;  %v127_v55 = vmul.f32 %v650_v49, %v60_v43  ;;  %v133_v56 = vmul.f32 %v652_v50, %v64_v44  ;;  %v659_v59 = vmul.f32 %v114_v52, %v624_v6 }
  0x2a   :  { %v662_v60 = vmul.f32 %v114_v52, %v626_v7  ;;  %v665_v61 = vmul.f32 %v114_v52, %v628_v8  ;;  %v104_v0 = vsel %vm103_vm8, %v508_v32, %v100_v53 }
  0x2b   :  { %v130_v1 = vadd.f32 %v127_v55, %v124_v54  ;;  %v126_v2 = vmul.f32 %v659_v59, %v58_v51  ;;  %v669_v4 = vmul.f32 %v104_v0, %v636_v13  ;;  %v672_v5 = vmul.f32 %v104_v0, %v638_v14 }
  0x2c   :  { %v129_v6 = vmul.f32 %v662_v60, %v62_v57  ;;  %v135_v7 = vmul.f32 %v665_v61, %v66_v58  ;;  %v677_v8 = vmul.f32 %v104_v0, %v640_v15 }
  0x2d   :  { %v136_v9 = vadd.f32 %v133_v56, %v130_v1  ;;  %v125_v10 = vmul.f32 %v669_v4, %v57_v62  ;;  %v128_v11 = vmul.f32 %v672_v5, %v61_v63 }
  0x2e   :  { %v132_v12 = vadd.f32 %v129_v6, %v126_v2  ;;  %v134_v16 = vmul.f32 %v677_v8, %v65_v3 }
  0x2f   :  { %v139_v13 = vmul.f32 %v136_v9, %v648_v48  ;;  %v145_v14 = vmul.f32 %v136_v9, %v650_v49  ;;  %v151_v17 = vmul.f32 %v136_v9, %v652_v50  ;;  %v131_v18 = vadd.f32 %v128_v11, %v125_v10 }
  0x30   :  { %v138_v19 = vadd.f32 %v135_v7, %v132_v12 }
  0x31   :  { %v685_v20 = vsub.f32 %v56_v42, %v139_v13  ;;  %v687_v15 = vsub.f32 %v60_v43, %v145_v14  ;;  %v154_v21 = vsub.f32 %v64_v44, %v151_v17  ;;  %v137_v22 = vadd.f32 %v134_v16, %v131_v18 }
  0x32   :  { %v141_v23 = vmul.f32 %v138_v19, %v659_v59  ;;  %v147_v24 = vmul.f32 %v138_v19, %v662_v60  ;;  %v153_v25 = vmul.f32 %v138_v19, %v665_v61 }
  0x33   :  { %v157_v26 = vmul.f32 %v685_v20, %v685_v20  ;;  %v160_v27 = vmul.f32 %v687_v15, %v687_v15  ;;  %v166_v28 = vmul.f32 %v154_v21, %v154_v21  ;;  %v140_v29 = vmul.f32 %v137_v22, %v669_v4 }
  0x34   :  { %v144_v30 = vsub.f32 %v58_v51, %v141_v23  ;;  %v150_v31 = vsub.f32 %v62_v57, %v147_v24  ;;  %v156_v32 = vsub.f32 %v66_v58, %v153_v25  ;;  %v146_v33 = vmul.f32 %v137_v22, %v672_v5 }
  0x35   :  { %v163_v34 = vadd.f32 %v160_v27, %v157_v26  ;;  %v698_v35 = vsub.f32 %v57_v62, %v140_v29  ;;  %v152_v36 = vmul.f32 %v137_v22, %v677_v8 }
  0x36   :  { %v159_v37 = vmul.f32 %v144_v30, %v144_v30  ;;  %v162_v38 = vmul.f32 %v150_v31, %v150_v31  ;;  %v168_v39 = vmul.f32 %v156_v32, %v156_v32  ;;  %v149_v40 = vsub.f32 %v61_v63, %v146_v33 }
  0x37   :  { %v169_v41 = vadd.f32 %v166_v28, %v163_v34  ;;  %v701_v42 = vsub.f32 %v65_v3, %v152_v36  ;;  %v158_v43 = vmul.f32 %v698_v35, %v698_v35 }
  0x38   :  { %v165_v44 = vadd.f32 %v162_v38, %v159_v37  ;;  %v161_v45 = vmul.f32 %v149_v40, %v149_v40 }
  0x39   :  { %v172_v46 = vmax.f32 %v169_v41, 1e-24  ;;  %v167_v47 = vmul.f32 %v701_v42, %v701_v42 }
  0x3a   :  { %v171_v51 = vadd.f32 %v168_v39, %v165_v44  ;;  %v164_v52 = vadd.f32 %v161_v45, %v158_v43 }
  0x3b   :  { %509 = vrsqrt.f32 %v172_v46  ;;  %vm181_vm9 = vweird.f32 %v172_v46 }
  0x3c   :  { %v174_v53 = vmax.f32 %v171_v51, 1e-24  ;;  %v170_v54 = vadd.f32 %v167_v47, %v164_v52 }
  0x3e   :  { %511 = vrsqrt.f32 %v174_v53  ;;  %v173_v55 = vmax.f32 %v170_v54, 1e-24  ;;  %vm201_vm12 = vweird.f32 %v174_v53 }
  0x40   :  { %513 = vrsqrt.f32 %v173_v55  ;;  %vm191_vm14 = vweird.f32 %v173_v55 }
  0x41   :  { %v510_v56 = vpop.eup %509 }
  0x42   :  { %v176_v57 = vmul.f32 %v510_v56, %v172_v46  ;;  %vm182_vm10 = vweird.f32 %v510_v56 }
  0x43   :  { %vm183_vm11 = vmor %vm181_vm9, %vm182_vm10 }
  0x44   :  { %v512_v58 = vpop.eup %511  ;;  %v177_v62 = vmul.f32 %v510_v56, %v176_v57  ;;  %v270_v57 = vld [vmem:[#allocation6 + $0x10] sm:$0xff] }
  0x45   :  { %v196_v63 = vmul.f32 %v512_v58, %v174_v53  ;;  %vm202_vm13 = vweird.f32 %v512_v58 }
  0x46   :  { %v514_v0 = vpop.eup %513  ;;  %v178_v1 = vmul.f32 0.5, %v177_v62  ;;  %vm203_vm0 = vmor %vm201_vm12, %vm202_vm13  ;;  %v285_v62 = vld [vmem:[#allocation6 + $0x88] sm:$0xff] }
  0x47   :  { %v197_v2 = vmul.f32 %v512_v58, %v196_v63  ;;  %v186_v3 = vmul.f32 %v514_v0, %v173_v55  ;;  %vm192_vm15 = vweird.f32 %v514_v0  ;;  %v272_v63 = vld [vmem:[#allocation6 + $0x20] sm:$0xff] }
  0x48   :  { %v179_v6 = vsub.f32 1.5, %v178_v1  ;;  %vm193_vm1 = vmor %vm191_vm14, %vm192_vm15  ;;  %v274_v1 = vld [vmem:[#allocation6 + $0x30] sm:$0xff] }
  0x49   :  { %v198_v7 = vmul.f32 0.5, %v197_v2  ;;  %v187_v9 = vmul.f32 %v514_v0, %v186_v3  ;;  %v282_v2 = vld [vmem:[#allocation6 + $0x70] sm:$0xff]  ;;  %v277_v3 = vld [vmem:[#allocation6 + $0x48] sm:$0xff] }
  0x4a   :  { %v180_v10 = vmul.f32 %v510_v56, %v179_v6  ;;  %v284_v6 = vld [vmem:[#allocation6 + $0x80] sm:$0xff] }
  0x4b   :  { %v199_v11 = vsub.f32 1.5, %v198_v7  ;;  %v188_v12 = vmul.f32 0.5, %v187_v9  ;;  %v279_v7 = vld [vmem:[#allocation6 + $0x58] sm:$0xff] }
  0x4c   :  { %v184_v16 = vsel %vm183_vm11, %v510_v56, %v180_v10 }
  0x4d   :  { %v707_v13 = vmul.f32 %v184_v16, %v154_v21  ;;  %v200_v14 = vmul.f32 %v512_v58, %v199_v11  ;;  %v189_v17 = vsub.f32 1.5, %v188_v12  ;;  %v208_v18 = vmul.f32 %v184_v16, %v687_v15 }
  0x4e   :  { %v205_v23 = vmul.f32 %v184_v16, %v685_v20 }
  0x4f   :  { %341 = vmatpush.msra.mxu0 %v707_v13  ;;  %469 = vmatpush.msra.mxu2 %v707_v13  ;;  %v204_v19 = vsel %vm203_vm0, %v512_v58, %v200_v14  ;;  %v190_v22 = vmul.f32 %v514_v0, %v189_v17  ;;  %v232_v33 = vmul.f32 %v208_v18, %v648_v48  ;;  %v278_v58 = vld [vmem:[#allocation6 + $0x50] sm:$0xff] }
  0x50   :  { %v210_v24 = vmul.f32 %v204_v19, %v150_v31  ;;  %v207_v25 = vmul.f32 %v204_v19, %v144_v30  ;;  %v713_v27 = vmul.f32 %v204_v19, %v156_v32  ;;  %v235_v34 = vmul.f32 %v205_v23, %v650_v49 }
  0x51   :  { %v194_v26 = vsel %vm193_vm1, %v514_v0, %v190_v22  ;;  %v226_v43 = vmul.f32 %v707_v13, %v648_v48  ;;  %v214_v54 = vmul.f32 %v707_v13, %v650_v49  ;;  %v217_v55 = vmul.f32 %v208_v18, %v652_v50  ;;  %v280_v0 = vld [vmem:[#allocation6 + $0x60] sm:$0xff] }
  0x52   :  { %342 = vmatpush.msra.mxu0 %v210_v24  ;;  %470 = vmatpush.msra.mxu2 %v210_v24  ;;  %v209_v21 = vmul.f32 %v194_v26, %v149_v40  ;;  %v234_v28 = vmul.f32 %v210_v24, %v659_v59  ;;  %v237_v15 = vmul.f32 %v207_v25, %v662_v60 }
  0x53   :  { %v206_v29 = vmul.f32 %v194_v26, %v698_v35  ;;  %v722_v31 = vmul.f32 %v194_v26, %v701_v42  ;;  %v225_v36 = vmul.f32 %v207_v25, %v665_v61  ;;  %v228_v37 = vmul.f32 %v713_v27, %v659_v59 }
  0x54   :  { %343 = vmatpush.msra.mxu0 %v209_v21  ;;  %471 = vmatpush.msra.mxu2 %v209_v21  ;;  %v240_v20 = vsub.f32 %v234_v28, %v237_v15  ;;  %v233_v30 = vmul.f32 %v209_v21, %v669_v4  ;;  %v238_v38 = vsub.f32 %v232_v33, %v235_v34 }
  0x55   :  { %v236_v32 = vmul.f32 %v206_v29, %v672_v5  ;;  %v224_v39 = vmul.f32 %v206_v29, %v677_v8  ;;  %v227_v40 = vmul.f32 %v722_v31, %v669_v4  ;;  %v231_v41 = vsub.f32 %v225_v36, %v228_v37 }
  0x56   :  { %390 = vmatpush.msra.mxu1 %v240_v20  ;;  %344 = vmatpush.msra.mxu0 %v208_v18  ;;  %v223_v42 = vmul.f32 %v205_v23, %v652_v50  ;;  %v216_v45 = vmul.f32 %v713_v27, %v662_v60  ;;  %v219_v46 = vmul.f32 %v210_v24, %v665_v61 }
  0x57   :  { %472 = vmatpush.msra.mxu2 %v208_v18  ;;  %v239_v35 = vsub.f32 %v233_v30, %v236_v32  ;;  %485 = vmatpush.msra.mxu3 %v240_v20  ;;  %v230_v44 = vsub.f32 %v224_v39, %v227_v40  ;;  %v215_v51 = vmul.f32 %v722_v31, %v672_v5 }
  0x58   :  { %345 = vmatpush.msra.mxu0 %v207_v25  ;;  %v229_v47 = vsub.f32 %v223_v42, %v226_v43  ;;  %v218_v52 = vmul.f32 %v209_v21, %v677_v8  ;;  %v222_v53 = vsub.f32 %v216_v45, %v219_v46 }
  0x59   :  { %391 = vmatpush.msra.mxu1 %v239_v35  ;;  %473 = vmatpush.msra.mxu2 %v207_v25 }
  0x5a   :  { %346 = vmatpush.msra.mxu0 %v206_v29  ;;  %486 = vmatpush.msra.mxu3 %v239_v35  ;;  %v221_v56 = vsub.f32 %v215_v51, %v218_v52 }
  0x5b   :  { %392 = vmatpush.msra.mxu1 %v238_v38  ;;  %474 = vmatpush.msra.mxu2 %v206_v29 }
  0x5c   :  { %347 = vmatpush.msra.mxu0 %v205_v23  ;;  %487 = vmatpush.msra.mxu3 %v238_v38 }
  0x5d   :  { %393 = vmatpush.msra.mxu1 %v231_v41  ;;  %475 = vmatpush.msra.mxu2 %v205_v23 }
  0x5e   :  { %348 = vmatpush.msra.mxu0 %v665_v61  ;;  %488 = vmatpush.msra.mxu3 %v231_v41 }
  0x5f   :  { %394 = vmatpush.msra.mxu1 %v230_v44  ;;  %476 = vmatpush.msra.mxu2 %v665_v61  ;;  %v220_v61 = vsub.f32 %v214_v54, %v217_v55 }
  0x60   :  { %349 = vmatpush.msra.mxu0 %v677_v8  ;;  %489 = vmatpush.msra.mxu3 %v230_v44 }
  0x61   :  { %395 = vmatpush.msra.mxu1 %v229_v47  ;;  %477 = vmatpush.msra.mxu2 %v677_v8  ;;  %v276_v8 = vld [vmem:[#allocation6 + $0x40] sm:$0xff] }
  0x62   :  { %350 = vmatpush.msra.mxu0 %v652_v50  ;;  %490 = vmatpush.msra.mxu3 %v229_v47 }
  0x63   :  { %396 = vmatpush.msra.mxu1 %v222_v53  ;;  %478 = vmatpush.msra.mxu2 %v652_v50  ;;  %v269_v50 = vld [vmem:[#allocation6 + $0x8] sm:$0xff] }
  0x64   :  { %351 = vmatpush.msra.mxu0 %v662_v60  ;;  %491 = vmatpush.msra.mxu3 %v222_v53 }
  0x65   :  { %397 = vmatpush.msra.mxu1 %v221_v56  ;;  %479 = vmatpush.msra.mxu2 %v662_v60  ;;  %v281_v60 = vld [vmem:[#allocation6 + $0x68] sm:$0xff] }
  0x66   :  { %352 = vmatpush.msra.mxu0 %v672_v5  ;;  %492 = vmatpush.msra.mxu3 %v221_v56 }
  0x67   :  { %398 = vmatpush.msra.mxu1 %v220_v61  ;;  %480 = vmatpush.msra.mxu2 %v672_v5  ;;  %v268_v5 = vld [vmem:[#allocation6] sm:$0xff] }
  0x68   :  { %353 = vmatpush.msra.mxu0 %v650_v49  ;;  %493 = vmatpush.msra.mxu3 %v220_v61 }
  0x69   :  { %399 = vmatpush.msra.mxu1 %v713_v27  ;;  %481 = vmatpush.msra.mxu2 %v650_v49  ;;  %v271_v49 = vld [vmem:[#allocation6 + $0x18] sm:$0xff] }
  0x6a   :  { %354 = vmatpush.msra.mxu0 %v659_v59  ;;  %494 = vmatpush.msra.mxu3 %v713_v27 }
  0x6b   :  { %400 = vmatpush.msra.mxu1 %v722_v31  ;;  %482 = vmatpush.msra.mxu2 %v659_v59  ;;  %v283_v59 = vld [vmem:[#allocation6 + $0x78] sm:$0xff] }
  0x6c   :  { %460 = vmatmul.msk.f32.vlgmr.msra.gmra.mxu1 %vm313_vm2, %v269_v50  ;;  %355 = vmatpush.msra.mxu0 %v669_v4 }
  0x6d   :  { %483 = vmatpush.msra.mxu2 %v669_v4  ;;  %495 = vmatpush.msra.mxu3 %v722_v31  ;;  %v273_v4 = vld [vmem:[#allocation6 + $0x28] sm:$0xff] }
  0x6e   :  { %356 = vmatpush.msra.mxu0 %v648_v48  ;;  %466 = vmatmul.msk.f32.vlgmr.msra.gmra.mxu3 %vm313_vm2, %v281_v60 }
  0x6f   :  { %484 = vmatpush.msra.mxu2 %v648_v48  ;;  %357 = vmatmul.f32.vlgmr.msra.gmra.mxu0 %v268_v5  ;;  %v275_v48 = vld [vmem:[#allocation6 + $0x38] sm:$0xff] }
  0x70   :  { %369 = vmatmul.f32.vlgmr.msra.gmra.mxu2 %v276_v8 }
  0x74   :  { %461 = vmatmul.msk.f32.gmra.mxu1 %vm313_vm2, %v271_v49 }
  0x76   :  { %467 = vmatmul.msk.f32.gmra.mxu3 %vm313_vm2, %v283_v59 }
  0x77   :  { %360 = vmatmul.f32.gmra.mxu0 %v270_v57 }
  0x78   :  { %372 = vmatmul.f32.gmra.mxu2 %v278_v58 }
  0x7c   :  { %462 = vmatmul.msk.f32.gmra.mxu1 %vm313_vm2, %v273_v4 }
  0x7e   :  { %468 = vmatmul.msk.f32.gmra.mxu3 %vm313_vm2, %v285_v62 }
  0x7f   :  { %363 = vmatmul.f32.gmra.mxu0 %v272_v63 }
  0x80   :  { %375 = vmatmul.f32.gmra.mxu2 %v280_v0 }
  0x84   :  { %463 = vmatmul.msk.f32.gmra.mxu1 %vm313_vm2, %v275_v48 }
  0x87   :  { %366 = vmatmul.f32.gmra.mxu0 %v274_v1 }
  0x88   :  { %378 = vmatmul.f32.gmra.mxu2 %v282_v2 }
  0x8c   :  { %464 = vmatmul.msk.f32.gmra.mxu1 %vm313_vm2, %v277_v3 }
  0x90   :  { %381 = vmatmul.f32.gmra.mxu2 %v284_v6 }
  0x94   :  { %465 = vmatmul.msk.f32.gmra.mxu1 %vm313_vm2, %v279_v7 }
  0xe9   :  { %v402_v9 = vpop.f32.mrf.mxu1 }
  0xec   :  { %v358_v10 = vpop.f32.mrf.mxu0 }
  0xed   :  { %v403_v11 = vadd.f32 %v402_v9, %v358_v10 }
  0xef   :  { %429 = vst [vmem:[#allocation8] sm:$0xff] %v403_v11 }
  0xf1   :  { %v405_v12 = vpop.f32.mrf.mxu1  ;;  %v420_v23 = vpop.f32.mrf.mxu3 }
  0xf3   :  { %v370_v16 = vpop.f32.mrf.mxu2 }
  0xf4   :  { %v361_v13 = vpop.f32.mrf.mxu0 }
  0xf5   :  { %v406_v14 = vadd.f32 %v405_v12, %v361_v13 }
  0xf7   :  { %430 = vst [vmem:[#allocation8 + $0x8] sm:$0xff] %v406_v14 }
  0xf9   :  { %v408_v17 = vpop.f32.mrf.mxu1  ;;  %v423_v28 = vpop.f32.mrf.mxu3 }
  0xfb   :  { %v373_v18 = vpop.f32.mrf.mxu2 }
  0xfc   :  { %v364_v19 = vpop.f32.mrf.mxu0 }
  0xfd   :  { %v409_v22 = vadd.f32 %v408_v17, %v364_v19 }
  0xff   :  { %431 = vst [vmem:[#allocation8 + $0x10] sm:$0xff] %v409_v22 }
 0x101   :  { %v411_v24 = vpop.f32.mrf.mxu1  ;;  %v426_v30 = vpop.f32.mrf.mxu3 }
 0x103   :  { %v376_v25 = vpop.f32.mrf.mxu2 }
 0x104   :  { %v421_v26 = vadd.f32 %v420_v23, %v376_v25  ;;  %v367_v27 = vpop.f32.mrf.mxu0 }
 0x105   :  { %v412_v21 = vadd.f32 %v411_v24, %v367_v27 }
 0x106   :  { %437 = vst [vmem:[#allocation8 + $0x30] sm:$0xff] %v421_v26 }
 0x107   :  { %433 = vst [vmem:[#allocation8 + $0x18] sm:$0xff] %v412_v21 }
 0x109   :  { %v414_v15 = vpop.f32.mrf.mxu1 }
 0x10a   :  { %v415_v29 = vadd.f32 %v414_v15, %v370_v16 }
 0x10b   :  { %v379_v33 = vpop.f32.mrf.mxu2 }
 0x10c   :  { %434 = vst [vmem:[#allocation8 + $0x20] sm:$0xff] %v415_v29  ;;  %v424_v34 = vadd.f32 %v423_v28, %v379_v33 }
 0x10e   :  { %438 = vst [vmem:[#allocation8 + $0x38] sm:$0xff] %v424_v34 }
 0x111   :  { %v417_v20 = vpop.f32.mrf.mxu1 }
 0x112   :  { %v418_v31 = vadd.f32 %v417_v20, %v373_v18 }
 0x113   :  { %v382_v32 = vpop.f32.mrf.mxu2 }
 0x114   :  { %435 = vst [vmem:[#allocation8 + $0x28] sm:$0xff] %v418_v31  ;;  %v427_v36 = vadd.f32 %v426_v30, %v382_v32 }
 0x116   :  { %439 = vst [vmem:[#allocation8 + $0x40] sm:$0xff] %v427_v36 }
 0x117   :  { %452 = dma.vmem_to_hbm [thread:$0]  %s445_s22, 1152, %s447_s25, [#allocation5], %s594_s17, %s594_s17, %s595_s18  }
 0x118   :  { %591 = dma.done.wait [#allocation5], 1152  }
 0x119   :  { %592 = vsyncadd [#allocation5], 4294966144 }
 0x11a   :  { %457 = vsyncpa [#allocation4], 1 }
 0x11b   :  { %458 = vsyncpa [#allocation7], 1 }
 0x11c   :  { %459 = vsyncpa [#allocation5], 1 }

</bundles_post_ra>
